<compile_context>
chip_gen: v7x
topology: tpu7x:2x2x1
jax: 0.10.0
libtpu: 0.0.40
codegen_flags: <defaults>
</compile_context>

<pallas_src>
import numpy as np
import jax
import jax.numpy as jnp
from jax.experimental import pallas as pl
from jax.experimental.pallas import tpu as pltpu


def _round_up(v, m):
    return ((v + m - 1) // m) * m


def single_conv_forward(x, conv_w, conv_b, gamma, beta, running_mean,
                        running_var, *, eps=1e-5, out_dtype=jnp.float32):
    """SingleConv forward (inference).

    x:       (B, C, D, H, W) float32, NCDHW (PyTorch layout)
    conv_w:  (O, C, 3, 3, 3), conv_b: (O,)
    gamma/beta/running_mean/running_var: (O,) BatchNorm3d params (eval mode)
    Returns (B, O, D, H, W) in out_dtype (default float32; pass bfloat16 to
    halve output HBM bytes if downstream tolerates it).
    """
    B, C, D, H, W = x.shape
    O = conv_w.shape[0]
    Dp, Hp, Wp = D + 2, H + 2, W + 2
    M_plane = H * Wp                       # anchor rows computed per output plane
    R_in = _round_up(Hp * Wp + 2, 8)       # padded plane rows (covers max tap offset)

    # ---- wrapper glue (cheap, bf16): channel-last, halo pad, flatten rows ----
    x_cl = jnp.transpose(x, (0, 2, 3, 4, 1)).astype(jnp.bfloat16)    # (B,D,H,W,C)
    xp = jnp.pad(x_cl, ((0, 0), (1, 1), (1, 1), (1, 1), (0, 0)))     # (B,Dp,Hp,Wp,C)
    x_rows = xp.reshape(B, Dp, Hp * Wp, C)
    x_rows = jnp.pad(x_rows, ((0, 0), (0, 0), (0, R_in - Hp * Wp), (0, 0)))

    # conv weight (O,C,3,3,3) -> (kd, kh*3+kw, C, O), bf16 MXU operands.
    w = jnp.transpose(conv_w, (2, 3, 4, 1, 0)).reshape(3, 9, C, O).astype(jnp.bfloat16)

    # Fold conv bias + BatchNorm (inference) into one per-channel affine.
    inv_std = jax.lax.rsqrt(running_var.astype(jnp.float32) + eps)
    scale = gamma.astype(jnp.float32) * inv_std                       # (O,)
    shift = (conv_b.astype(jnp.float32)
             - running_mean.astype(jnp.float32)) * scale + beta.astype(jnp.float32)
    ss = jnp.stack([scale, shift], axis=0)                            # (2, O) f32

    def kernel(x_ref, w_ref, ss_ref, o_ref, acc_ref):
        # x_ref:  (R_in, C)   bf16  one padded, row-flattened input plane (d + kd)
        # w_ref:  (9, C, O)   bf16  the 9 in-plane taps of depth-tap kd
        # ss_ref: (2, O)      f32   [scale; shift]
        # o_ref:  (M_plane,O)       output plane (anchor rows, cropped in wrapper)
        # acc_ref:(M_plane,O) f32   accumulator across the 3 depth taps
        kd = pl.program_id(2)

        @pl.when(kd == 0)
        def _init():
            acc_ref[...] = jnp.zeros_like(acc_ref)

        acc = acc_ref[...]
        for kh in range(3):
            for kw in range(3):
                off = kh * Wp + kw                         # static row offset
                tap = x_ref[off:off + M_plane, :]          # (M_plane, C) bf16
                wt = w_ref[kh * 3 + kw]                    # (C, O) bf16
                acc = acc + jnp.dot(tap, wt, preferred_element_type=jnp.float32)
        acc_ref[...] = acc

        @pl.when(kd == pl.num_programs(2) - 1)
        def _finalize():
            y = acc * ss_ref[0:1, :] + ss_ref[1:2, :]
            o_ref[...] = jnp.maximum(y, 0.0).astype(o_ref.dtype)

    out_itemsize = np.dtype(out_dtype).itemsize
    flops = 2 * B * D * M_plane * 27 * C * O
    bytes_accessed = (3 * B * D * R_in * C * 2          # input planes (bf16, read 3x)
                      + 3 * B * D * 9 * C * O * 2       # per-kd weight slices (bf16)
                      + B * D * M_plane * O * out_itemsize
                      + 2 * O * 4)

    out_big = pl.pallas_call(
        kernel,
        out_shape=jax.ShapeDtypeStruct((B, D, M_plane, O), out_dtype),
        grid_spec=pltpu.PrefetchScalarGridSpec(
            num_scalar_prefetch=0,
            grid=(B, D, 3),
            in_specs=[
                # Input plane d + kd of batch b (block index along Dp is d + kd).
                pl.BlockSpec((None, None, R_in, C), lambda b, d, k: (b, d + k, 0, 0)),
                # 9 in-plane taps of depth-tap kd.
                pl.BlockSpec((None, 9, C, O), lambda b, d, k: (k, 0, 0, 0)),
                # Grid-invariant merged scale/shift.
                pl.BlockSpec((2, O), lambda b, d, k: (0, 0)),
            ],
            out_specs=pl.BlockSpec((None, None, M_plane, O),
                                   lambda b, d, k: (b, d, 0, 0)),
            scratch_shapes=[pltpu.VMEM((M_plane, O), jnp.float32)],
        ),
        compiler_params=pltpu.CompilerParams(
            dimension_semantics=("parallel", "parallel", "arbitrary"),
            vmem_limit_bytes=32 * 1024 * 1024,
        ),
        cost_estimate=pl.CostEstimate(flops=flops, transcendentals=0,
                                      bytes_accessed=bytes_accessed),
    )(x_rows, w, ss)

    # Crop the Wp-anchor superset back to W and return NCDHW.
    out = out_big.reshape(B, D, H, Wp, O)[:, :, :, :W, :]             # (B,D,H,W,O)
    return jnp.transpose(out, (0, 4, 1, 2, 3))                        # (B,O,D,H,W)


if __name__ == "__main__":
    # Small shapes consistent with the module: in_ch=4, out_ch=8, 8^3 volume.
    B, C, O = 2, 4, 8
    D = H = W = 8
    eps = 1e-5

    key = jax.random.PRNGKey(0)
    kx, kw, kb, kg, kbe, km, kv = jax.random.split(key, 7)

    x = jax.random.normal(kx, (B, C, D, H, W), dtype=jnp.float32)
    conv_w = jax.random.normal(kw, (O, C, 3, 3, 3), dtype=jnp.float32) * 0.05
    conv_b = jax.random.normal(kb, (O,), dtype=jnp.float32) * 0.05
    gamma = 1.0 + 0.1 * jax.random.normal(kg, (O,), dtype=jnp.float32)
    beta = 0.1 * jax.random.normal(kbe, (O,), dtype=jnp.float32)
    running_mean = 0.1 * jax.random.normal(km, (O,), dtype=jnp.float32)
    running_var = 1.0 + 0.5 * jax.random.uniform(kv, (O,), dtype=jnp.float32)

    out = single_conv_forward(x, conv_w, conv_b, gamma, beta,
                              running_mean, running_var, eps=eps)
    out = jax.block_until_ready(out)
    assert out.shape == (B, O, D, H, W), out.shape

    # Pure-JAX f32 reference; kernel uses bf16 MXU operands, so compare with a
    # bf16-sized tolerance.
    conv = jax.lax.conv_general_dilated(
        x, conv_w, window_strides=(1, 1, 1),
        padding=((1, 1), (1, 1), (1, 1)),
        dimension_numbers=("NCDHW", "OIDHW", "NCDHW"))
    conv = conv + conv_b.reshape(1, O, 1, 1, 1)
    inv_std = 1.0 / jnp.sqrt(running_var + eps)
    ref = (conv - running_mean.reshape(1, O, 1, 1, 1)) \
        * (gamma * inv_std).reshape(1, O, 1, 1, 1) + beta.reshape(1, O, 1, 1, 1)
    ref = jnp.maximum(ref, 0.0)

    max_err = float(jnp.max(jnp.abs(out - ref)))
    assert jnp.allclose(out, ref, atol=5e-2, rtol=5e-2), max_err
    print("KERNEL_OK")
</pallas_src>

<mosaic_0001>
module attributes {stable_mosaic.version = 11 : i64} {
  func.func @kernel(%arg0: i32, %arg1: i32, %arg2: i32, %arg3: memref<1x1x104x4xbf16, #tpu.memory_space<vmem>>, %arg4: memref<1x9x4x8xbf16, #tpu.memory_space<vmem>>, %arg5: memref<2x8xf32, #tpu.memory_space<vmem>>, %arg6: memref<1x1x80x8xf32, #tpu.memory_space<vmem>>, %arg7: memref<80x8xf32, #tpu.memory_space<vmem>>) attributes {dimension_semantics = [#tpu.dimension_semantics<parallel>, #tpu.dimension_semantics<parallel>, #tpu.dimension_semantics<arbitrary>], iteration_bounds = array<i64: 2, 8, 3>, scalar_prefetch = 0 : i64, scratch_operands = 1 : i64, tpu.core_type = #tpu.core_type<tc>, window_params = [{transform_indices = @transform_0, window_bounds = array<i64: 1, 1, 104, 4>}, {transform_indices = @transform_1, window_bounds = array<i64: 1, 9, 4, 8>}, {pipeline_mode = #tpu.pipeline_mode<synchronous>, transform_indices = @transform_2, window_bounds = array<i64: 2, 8>}, {transform_indices = @transform_3, window_bounds = array<i64: 1, 1, 80, 8>}]} {
    %c0_i32 = arith.constant 0 : i32
    %0 = arith.cmpi eq, %arg2, %c0_i32 : i32
    %1 = arith.extui %0 : i1 to i32
    %c0_i32_0 = arith.constant 0 : i32
    %2 = arith.cmpi ne, %1, %c0_i32_0 : i32
    scf.if %2 {
      %cst_71 = arith.constant 0.000000e+00 : f32
      %62 = vector.broadcast %cst_71 : f32 to vector<80x8xf32>
      %c0_72 = arith.constant 0 : index
      %c0_73 = arith.constant 0 : index
      %63 = vector.load %arg7[%c0_72, %c0_73] : memref<80x8xf32, #tpu.memory_space<vmem>>, vector<80x8xf32>
      tpu.vector_store %arg7[%c0_72, %c0_73], %62 {strides = array<i32>} : memref<80x8xf32, #tpu.memory_space<vmem>>, vector<80x8xf32>,
    } else {
    }
    %c0 = arith.constant 0 : index
    %c0_1 = arith.constant 0 : index
    %3 = vector.load %arg7[%c0, %c0_1] : memref<80x8xf32, #tpu.memory_space<vmem>>, vector<80x8xf32>
    %c0_2 = arith.constant 0 : index
    %c0_3 = arith.constant 0 : index
    %c0_4 = arith.constant 0 : index
    %c0_5 = arith.constant 0 : index
    %4 = vector.load %arg3[%c0_2, %c0_3, %c0_4, %c0_5] : memref<1x1x104x4xbf16, #tpu.memory_space<vmem>>, vector<1x1x80x4xbf16>
    %5 = vector.shape_cast %4 : vector<1x1x80x4xbf16> to vector<80x4xbf16>
    %c0_6 = arith.constant 0 : index
    %c0_7 = arith.constant 0 : index
    %c0_8 = arith.constant 0 : index
    %c0_9 = arith.constant 0 : index
    %6 = vector.load %arg4[%c0_6, %c0_7, %c0_8, %c0_9] : memref<1x9x4x8xbf16, #tpu.memory_space<vmem>>, vector<1x1x4x8xbf16>
    %7 = vector.shape_cast %6 : vector<1x1x4x8xbf16> to vector<4x8xbf16>
    %cst = arith.constant dense<0.000000e+00> : vector<80x8xf32>
    %8 = tpu.matmul %5, %7, %cst {dimension_numbers = #tpu.dot_dimension_numbers<[1], [0], [0], [1], [0, 0, 1, 1], [], []>} : vector<80x4xbf16>, vector<4x8xbf16>, vector<80x8xf32> -> vector<80x8xf32>
    %9 = arith.addf %3, %8 : vector<80x8xf32>
    %c0_10 = arith.constant 0 : index
    %c0_11 = arith.constant 0 : index
    %c1 = arith.constant 1 : index
    %c0_12 = arith.constant 0 : index
    %10 = vector.load %arg3[%c0_10, %c0_11, %c1, %c0_12] : memref<1x1x104x4xbf16, #tpu.memory_space<vmem>>, vector<1x1x80x4xbf16>
    %11 = vector.shape_cast %10 : vector<1x1x80x4xbf16> to vector<80x4xbf16>
    %c0_13 = arith.constant 0 : index
    %c1_14 = arith.constant 1 : index
    %c0_15 = arith.constant 0 : index
    %c0_16 = arith.constant 0 : index
    %12 = vector.load %arg4[%c0_13, %c1_14, %c0_15, %c0_16] : memref<1x9x4x8xbf16, #tpu.memory_space<vmem>>, vector<1x1x4x8xbf16>
    %13 = vector.shape_cast %12 : vector<1x1x4x8xbf16> to vector<4x8xbf16>
    %cst_17 = arith.constant dense<0.000000e+00> : vector<80x8xf32>
    %14 = tpu.matmul %11, %13, %cst_17 {dimension_numbers = #tpu.dot_dimension_numbers<[1], [0], [0], [1], [0, 0, 1, 1], [], []>} : vector<80x4xbf16>, vector<4x8xbf16>, vector<80x8xf32> -> vector<80x8xf32>
    %15 = arith.addf %9, %14 : vector<80x8xf32>
    %c0_18 = arith.constant 0 : index
    %c0_19 = arith.constant 0 : index
    %c2 = arith.constant 2 : index
    %c0_20 = arith.constant 0 : index
    %16 = vector.load %arg3[%c0_18, %c0_19, %c2, %c0_20] : memref<1x1x104x4xbf16, #tpu.memory_space<vmem>>, vector<1x1x80x4xbf16>
    %17 = vector.shape_cast %16 : vector<1x1x80x4xbf16> to vector<80x4xbf16>
    %c0_21 = arith.constant 0 : index
    %c2_22 = arith.constant 2 : index
    %c0_23 = arith.constant 0 : index
    %c0_24 = arith.constant 0 : index
    %18 = vector.load %arg4[%c0_21, %c2_22, %c0_23, %c0_24] : memref<1x9x4x8xbf16, #tpu.memory_space<vmem>>, vector<1x1x4x8xbf16>
    %19 = vector.shape_cast %18 : vector<1x1x4x8xbf16> to vector<4x8xbf16>
    %cst_25 = arith.constant dense<0.000000e+00> : vector<80x8xf32>
    %20 = tpu.matmul %17, %19, %cst_25 {dimension_numbers = #tpu.dot_dimension_numbers<[1], [0], [0], [1], [0, 0, 1, 1], [], []>} : vector<80x4xbf16>, vector<4x8xbf16>, vector<80x8xf32> -> vector<80x8xf32>
    %21 = arith.addf %15, %20 : vector<80x8xf32>
    %c0_26 = arith.constant 0 : index
    %c0_27 = arith.constant 0 : index
    %c10 = arith.constant 10 : index
    %c0_28 = arith.constant 0 : index
    %22 = vector.load %arg3[%c0_26, %c0_27, %c10, %c0_28] : memref<1x1x104x4xbf16, #tpu.memory_space<vmem>>, vector<1x1x80x4xbf16>
    %23 = vector.shape_cast %22 : vector<1x1x80x4xbf16> to vector<80x4xbf16>
    %c0_29 = arith.constant 0 : index
    %c3 = arith.constant 3 : index
    %c0_30 = arith.constant 0 : index
    %c0_31 = arith.constant 0 : index
    %24 = vector.load %arg4[%c0_29, %c3, %c0_30, %c0_31] : memref<1x9x4x8xbf16, #tpu.memory_space<vmem>>, vector<1x1x4x8xbf16>
    %25 = vector.shape_cast %24 : vector<1x1x4x8xbf16> to vector<4x8xbf16>
    %cst_32 = arith.constant dense<0.000000e+00> : vector<80x8xf32>
    %26 = tpu.matmul %23, %25, %cst_32 {dimension_numbers = #tpu.dot_dimension_numbers<[1], [0], [0], [1], [0, 0, 1, 1], [], []>} : vector<80x4xbf16>, vector<4x8xbf16>, vector<80x8xf32> -> vector<80x8xf32>
    %27 = arith.addf %21, %26 : vector<80x8xf32>
    %c0_33 = arith.constant 0 : index
    %c0_34 = arith.constant 0 : index
    %c11 = arith.constant 11 : index
    %c0_35 = arith.constant 0 : index
    %28 = vector.load %arg3[%c0_33, %c0_34, %c11, %c0_35] : memref<1x1x104x4xbf16, #tpu.memory_space<vmem>>, vector<1x1x80x4xbf16>
    %29 = vector.shape_cast %28 : vector<1x1x80x4xbf16> to vector<80x4xbf16>
    %c0_36 = arith.constant 0 : index
    %c4 = arith.constant 4 : index
    %c0_37 = arith.constant 0 : index
    %c0_38 = arith.constant 0 : index
    %30 = vector.load %arg4[%c0_36, %c4, %c0_37, %c0_38] : memref<1x9x4x8xbf16, #tpu.memory_space<vmem>>, vector<1x1x4x8xbf16>
    %31 = vector.shape_cast %30 : vector<1x1x4x8xbf16> to vector<4x8xbf16>
    %cst_39 = arith.constant dense<0.000000e+00> : vector<80x8xf32>
    %32 = tpu.matmul %29, %31, %cst_39 {dimension_numbers = #tpu.dot_dimension_numbers<[1], [0], [0], [1], [0, 0, 1, 1], [], []>} : vector<80x4xbf16>, vector<4x8xbf16>, vector<80x8xf32> -> vector<80x8xf32>
    %33 = arith.addf %27, %32 : vector<80x8xf32>
    %c0_40 = arith.constant 0 : index
    %c0_41 = arith.constant 0 : index
    %c12 = arith.constant 12 : index
    %c0_42 = arith.constant 0 : index
    %34 = vector.load %arg3[%c0_40, %c0_41, %c12, %c0_42] : memref<1x1x104x4xbf16, #tpu.memory_space<vmem>>, vector<1x1x80x4xbf16>
    %35 = vector.shape_cast %34 : vector<1x1x80x4xbf16> to vector<80x4xbf16>
    %c0_43 = arith.constant 0 : index
    %c5 = arith.constant 5 : index
    %c0_44 = arith.constant 0 : index
    %c0_45 = arith.constant 0 : index
    %36 = vector.load %arg4[%c0_43, %c5, %c0_44, %c0_45] : memref<1x9x4x8xbf16, #tpu.memory_space<vmem>>, vector<1x1x4x8xbf16>
    %37 = vector.shape_cast %36 : vector<1x1x4x8xbf16> to vector<4x8xbf16>
    %cst_46 = arith.constant dense<0.000000e+00> : vector<80x8xf32>
    %38 = tpu.matmul %35, %37, %cst_46 {dimension_numbers = #tpu.dot_dimension_numbers<[1], [0], [0], [1], [0, 0, 1, 1], [], []>} : vector<80x4xbf16>, vector<4x8xbf16>, vector<80x8xf32> -> vector<80x8xf32>
    %39 = arith.addf %33, %38 : vector<80x8xf32>
    %c0_47 = arith.constant 0 : index
    %c0_48 = arith.constant 0 : index
    %c20 = arith.constant 20 : index
    %c0_49 = arith.constant 0 : index
    %40 = vector.load %arg3[%c0_47, %c0_48, %c20, %c0_49] : memref<1x1x104x4xbf16, #tpu.memory_space<vmem>>, vector<1x1x80x4xbf16>
    %41 = vector.shape_cast %40 : vector<1x1x80x4xbf16> to vector<80x4xbf16>
    %c0_50 = arith.constant 0 : index
    %c6 = arith.constant 6 : index
    %c0_51 = arith.constant 0 : index
    %c0_52 = arith.constant 0 : index
    %42 = vector.load %arg4[%c0_50, %c6, %c0_51, %c0_52] : memref<1x9x4x8xbf16, #tpu.memory_space<vmem>>, vector<1x1x4x8xbf16>
    %43 = vector.shape_cast %42 : vector<1x1x4x8xbf16> to vector<4x8xbf16>
    %cst_53 = arith.constant dense<0.000000e+00> : vector<80x8xf32>
    %44 = tpu.matmul %41, %43, %cst_53 {dimension_numbers = #tpu.dot_dimension_numbers<[1], [0], [0], [1], [0, 0, 1, 1], [], []>} : vector<80x4xbf16>, vector<4x8xbf16>, vector<80x8xf32> -> vector<80x8xf32>
    %45 = arith.addf %39, %44 : vector<80x8xf32>
    %c0_54 = arith.constant 0 : index
    %c0_55 = arith.constant 0 : index
    %c21 = arith.constant 21 : index
    %c0_56 = arith.constant 0 : index
    %46 = vector.load %arg3[%c0_54, %c0_55, %c21, %c0_56] : memref<1x1x104x4xbf16, #tpu.memory_space<vmem>>, vector<1x1x80x4xbf16>
    %47 = vector.shape_cast %46 : vector<1x1x80x4xbf16> to vector<80x4xbf16>
    %c0_57 = arith.constant 0 : index
    %c7 = arith.constant 7 : index
    %c0_58 = arith.constant 0 : index
    %c0_59 = arith.constant 0 : index
    %48 = vector.load %arg4[%c0_57, %c7, %c0_58, %c0_59] : memref<1x9x4x8xbf16, #tpu.memory_space<vmem>>, vector<1x1x4x8xbf16>
    %49 = vector.shape_cast %48 : vector<1x1x4x8xbf16> to vector<4x8xbf16>
    %cst_60 = arith.constant dense<0.000000e+00> : vector<80x8xf32>
    %50 = tpu.matmul %47, %49, %cst_60 {dimension_numbers = #tpu.dot_dimension_numbers<[1], [0], [0], [1], [0, 0, 1, 1], [], []>} : vector<80x4xbf16>, vector<4x8xbf16>, vector<80x8xf32> -> vector<80x8xf32>
    %51 = arith.addf %45, %50 : vector<80x8xf32>
    %c0_61 = arith.constant 0 : index
    %c0_62 = arith.constant 0 : index
    %c22 = arith.constant 22 : index
    %c0_63 = arith.constant 0 : index
    %52 = vector.load %arg3[%c0_61, %c0_62, %c22, %c0_63] : memref<1x1x104x4xbf16, #tpu.memory_space<vmem>>, vector<1x1x80x4xbf16>
    %53 = vector.shape_cast %52 : vector<1x1x80x4xbf16> to vector<80x4xbf16>
    %c0_64 = arith.constant 0 : index
    %c8 = arith.constant 8 : index
    %c0_65 = arith.constant 0 : index
    %c0_66 = arith.constant 0 : index
    %54 = vector.load %arg4[%c0_64, %c8, %c0_65, %c0_66] : memref<1x9x4x8xbf16, #tpu.memory_space<vmem>>, vector<1x1x4x8xbf16>
    %55 = vector.shape_cast %54 : vector<1x1x4x8xbf16> to vector<4x8xbf16>
    %cst_67 = arith.constant dense<0.000000e+00> : vector<80x8xf32>
    %56 = tpu.matmul %53, %55, %cst_67 {dimension_numbers = #tpu.dot_dimension_numbers<[1], [0], [0], [1], [0, 0, 1, 1], [], []>} : vector<80x4xbf16>, vector<4x8xbf16>, vector<80x8xf32> -> vector<80x8xf32>
    %57 = arith.addf %51, %56 : vector<80x8xf32>
    %c0_68 = arith.constant 0 : index
    %c0_69 = arith.constant 0 : index
    %58 = vector.load %arg7[%c0_68, %c0_69] : memref<80x8xf32, #tpu.memory_space<vmem>>, vector<80x8xf32>
    tpu.vector_store %arg7[%c0_68, %c0_69], %57 {strides = array<i32>} : memref<80x8xf32, #tpu.memory_space<vmem>>, vector<80x8xf32>,
    %c2_i32 = arith.constant 2 : i32
    %59 = arith.cmpi eq, %arg2, %c2_i32 : i32
    %60 = arith.extui %59 : i1 to i32
    %c0_i32_70 = arith.constant 0 : i32
    %61 = arith.cmpi ne, %60, %c0_i32_70 : i32
    scf.if %61 {
      %c0_71 = arith.constant 0 : index
      %c0_72 = arith.constant 0 : index
      %62 = vector.load %arg5[%c0_71, %c0_72] : memref<2x8xf32, #tpu.memory_space<vmem>>, vector<1x8xf32>
      %63 = vector.broadcast %62 : vector<1x8xf32> to vector<80x8xf32>
      %64 = arith.mulf %57, %63 : vector<80x8xf32>
      %c1_73 = arith.constant 1 : index
      %c0_74 = arith.constant 0 : index
      %65 = vector.load %arg5[%c1_73, %c0_74] : memref<2x8xf32, #tpu.memory_space<vmem>>, vector<1x8xf32>
      %66 = vector.broadcast %65 : vector<1x8xf32> to vector<80x8xf32>
      %67 = arith.addf %64, %66 : vector<80x8xf32>
      %cst_75 = arith.constant 0.000000e+00 : f32
      %68 = vector.broadcast %cst_75 : f32 to vector<80x8xf32>
      %69 = arith.maximumf %67, %68 : vector<80x8xf32>
      %c0_76 = arith.constant 0 : index
      %c0_77 = arith.constant 0 : index
      %c0_78 = arith.constant 0 : index
      %c0_79 = arith.constant 0 : index
      %70 = vector.load %arg6[%c0_76, %c0_77, %c0_78, %c0_79] : memref<1x1x80x8xf32, #tpu.memory_space<vmem>>, vector<1x1x80x8xf32>
      %71 = vector.shape_cast %70 : vector<1x1x80x8xf32> to vector<80x8xf32>
      %72 = vector.shape_cast %69 : vector<80x8xf32> to vector<1x1x80x8xf32>
      tpu.vector_store %arg6[%c0_76, %c0_77, %c0_78, %c0_79], %72 {strides = array<i32>} : memref<1x1x80x8xf32, #tpu.memory_space<vmem>>, vector<1x1x80x8xf32>,
    } else {
    }
    return
  }
  func.func @transform_0(%arg0: i32, %arg1: i32, %arg2: i32) -> (i32, i32, i32, i32) {
    %0 = arith.addi %arg1, %arg2 : i32
    %c0_i32 = arith.constant 0 : i32
    %c0_i32_0 = arith.constant 0 : i32
    %c0_i32_1 = arith.constant 0 : i32
    return %arg0, %0, %c0_i32, %c0_i32_0 : i32, i32, i32, i32
  }
  func.func @transform_1(%arg0: i32, %arg1: i32, %arg2: i32) -> (i32, i32, i32, i32) {
    %c0_i32 = arith.constant 0 : i32
    %c0_i32_0 = arith.constant 0 : i32
    %c0_i32_1 = arith.constant 0 : i32
    %c0_i32_2 = arith.constant 0 : i32
    return %arg2, %c0_i32, %c0_i32_0, %c0_i32_1 : i32, i32, i32, i32
  }
  func.func @transform_2(%arg0: i32, %arg1: i32, %arg2: i32) -> (i32, i32) {
    %c0_i32 = arith.constant 0 : i32
    %c0_i32_0 = arith.constant 0 : i32
    %c0_i32_1 = arith.constant 0 : i32
    return %c0_i32, %c0_i32_0 : i32, i32
  }
  func.func @transform_3(%arg0: i32, %arg1: i32, %arg2: i32) -> (i32, i32, i32, i32) {
    %c0_i32 = arith.constant 0 : i32
    %c0_i32_0 = arith.constant 0 : i32
    %c0_i32_1 = arith.constant 0 : i32
    return %arg0, %arg1, %c0_i32, %c0_i32_0 : i32, i32, i32, i32
  }
}

</mosaic_0001>

<bundles_post_ra>
// kernel: tpu_custom_call.1
= control target key start
LH: loop header
LB: loop body
LE: loop exit
PB: predicated region body
PF: predicated region fallthrough
CT: control target
= control target key end

     0   :  { %s2436_s12 = smov 0   ;;  %s2438_s13 = smov 0   ;;  %s2938_s0 = inlined_call_operand.vmem [shape: bf16[2,10,104,4], index: 0, kind: input, shape index: {}]   ;;  %s2939_s1 = inlined_call_operand.vmem [shape: bf16[3,9,4,8], index: 1, kind: input, shape index: {}]   ;;  %s2940_s2 = inlined_call_operand.vmem [shape: f32[2,8], index: 2, kind: input, shape index: {}]   ;;  %s2941_s3 = inlined_call_operand.vmem [shape: f32[2,8,80,8], index: 3, kind: output, shape index: {}]  }
   0x1   :  { %s2440_s14 = smov 0   ;;  %s2442_s15 = smov 0  }
   0x2   :  { %s2444_s16 = smov 0   ;;  %s2446_s17 = smov 0  }
   0x3   :  { %s2448_s18 = smov 0  }
   0x4 LB: > { %s25_s19 = sadd.s32 1, %s2399_s15  ;;  %s28_s20 = sadd.s32 1, %s2403_s16  ;;  %s2411_s18 = sphi %s2448_s18, %s13_s18   ;;  %s2407_s17 = sphi %s2446_s17, %s2947_s17   ;;  %s2403_s16 = sphi %s2444_s16, %s2946_s16   ;;  %s2399_s15 = sphi %s2442_s15, %s2945_s15   ;;  %s2395_s14 = sphi %s2440_s14, %s2944_s14   ;;  %s2391_s13 = sphi %s2438_s13, %s2943_s13   ;;  %s2387_s12 = sphi %s2436_s12, %s2942_s12  }
   0x5   : > { %p26_p0 = scmp.ge.s32.totalorder %s25_s19, 3  ;;  %p1760_p1 = scmp.ge.s32.totalorder %s2411_s18, 1 }
   0x6   : > { %p178_p2 = scmp.lt.s32.totalorder %s2411_s18, 49  ;;  %s32_s21 = sadd.s32 1, %s2407_s17 }
   0x7   : > { %s2949_s19 = smov (%p26_p0, %s25_s19), 0  ;;  %s2951_s20 = smov (!%p26_p0, %s28_s20), %s2403_s16 }
   0x8   : > { %p179_p3 = pnand %p1760_p1, %p178_p2  ;;  %p30_p4 = scmp.ge.s32.totalorder %s2951_s20, 8 }
   0x9   : > { %s216_s22 = sadd.s32 (!%p179_p3), %s2387_s12, %s2391_s13  ;;  %p217_p6 = scmp.lt.s32.totalorder (!%p179_p3), %s2395_s14, 1 }
   0xa   : > { %s2953_s20 = smov (%p30_p4, %s2951_s20), 0  ;;  %s2955_s21 = smov (!%p30_p4, %s32_s21), %s2407_s17 }
   0xb   : > { %p34_p5 = scmp.ge.s32.totalorder %s2955_s21, 2  ;;  %182 = sbr.rel (%p179_p3) target bundleno = 443 (0x1bb), region = 32 }
   0xc   : > { %p219_p7 = scmp.lt.s32.totalorder (!%p179_p3), %s216_s22, 9  ;;  %p227_p8 = scmp.lt.s32.totalorder (!%p179_p3), %s2387_s12, 2 }
   0xd   : > { %s2957_s21 = smov (%p34_p5, %s2955_s21), 0  ;;  %p234_p9 = scmp.lt.s32.totalorder (!%p179_p3), %s2391_s13, 7 }
   0xe   : > { %p1764_p10 = scmp.ne.s32.totalorder (!%p179_p3), %s2387_s12, 0 }
  0x12   : > { %s2959_s14 = smov (!%p217_p6, %s2395_s14), 1  ;;  %s2961_s22 = smov (!%p219_p7, %s216_s22), 9 }
  0x13   : > { %s2266_s23 = smul.u32 130, %s2959_s14  ;;  %s2963_s13 = smov (!%p234_p9, %s2391_s13), 7  ;;  %vm246_vm0 = vcmask (!%p1764_p10), 64512   ;;  %v2413_v0 = vmov (!%p1764_p10), 0.0  }
  0x14   : > { %s2265_s24 = smul.u32 13, %s2961_s22  ;;  %247 = vst.msk [vmem:[#allocation2] sm:$0xff] (!%p1764_p10), %vm246_vm0, %v2413_v0  ;;  %248 = vst.msk [vmem:[#allocation2 + $0x8] sm:$0xff] (!%p1764_p10), %vm246_vm0, %v2413_v0 }
  0x15   : > { %s228_s25 = scalar_select %p227_p8, %s2387_s12, 2 }
  0x16   : > { %s223_s26 = sadd.s32 %s2266_s23, %s2265_s24  ;;  %s2269_s8 = smul.u32 80, %s2959_s14  ;;  %249 = vst.msk [vmem:[#allocation2 + $0x10] sm:$0xff] (!%p1764_p10), %vm246_vm0, %v2413_v0  ;;  %250 = vst.msk [vmem:[#allocation2 + $0x18] sm:$0xff] (!%p1764_p10), %vm246_vm0, %v2413_v0 }
  0x17   : > { %s1761_s27 = sshll.u32 %s223_s26, 2  ;;  %s2267_s28 = smul.u32 18, %s228_s25  ;;  %251 = vst.msk [vmem:[#allocation2 + $0x20] sm:$0xff] (!%p1764_p10), %vm246_vm0, %v2413_v0  ;;  %252 = vst.msk [vmem:[#allocation2 + $0x28] sm:$0xff] (!%p1764_p10), %vm246_vm0, %v2413_v0 }
  0x18   : > { %s2490_s4 = scalar_lea.vmem %s2938_s0, %s1761_s27  ;;  %s2268_s9 = smul.u32 10, %s2963_s13  ;;  %253 = vst.msk [vmem:[#allocation2 + $0x30] sm:$0xff] (!%p1764_p10), %vm246_vm0, %v2413_v0  ;;  %254 = vst.msk [vmem:[#allocation2 + $0x38] sm:$0xff] (!%p1764_p10), %vm246_vm0, %v2413_v0 }
  0x19   : > { %s2495_s7 = scalar_lea.vmem %s2939_s1, %s2267_s28  ;;  %245 = sbr.rel (%p1764_p10) target bundleno = 32 (0x20), region = 36  ;;  %255 = vst.msk [vmem:[#allocation2 + $0x40] sm:$0xff] (!%p1764_p10), %vm246_vm0, %v2413_v0  ;;  %256 = vst.msk [vmem:[#allocation2 + $0x48] sm:$0xff] (!%p1764_p10), %vm246_vm0, %v2413_v0 }
  0x1a   : > { %s238_s10 = sadd.s32 %s2269_s8, %s2268_s9 }
  0x1b   : > { %s1763_s11 = sshll.u32 %s238_s10, 3 }
  0x1c   : > { %s2501_s24 = scalar_lea.vmem %s2941_s3, %s1763_s11 }
  0x20 PF: > { %v277_v1 = vld [vmem:[%s2495_s7] sm:$0x3]  ;;  %vm319_vm1 = vcmask 1041408   ;;  %v2414_v3 = vmov 0.0   ;;  %vm2415_vm2 = vmmov 0   ;;  %vm303_vm3 = vcmask 31744  }
  0x21   : > { %v2329_v2 = vld [vmem:[%s2490_s4] sm:$0xff]   ;;  %1905 = vmatprep.subr.bf16.mxu1 %v2414_v3  ;;  %v321_v4 = vsel %vm319_vm1, %v277_v1, 0  ;;  %1907 = vmatprep.mubr.msk.bf16.mxu1 %vm2415_vm2, %v2414_v3  ;;  %v1806_v5 = vld [vmem:[%s2495_s7 + $0x8] sm:$0x3]  ;;  %v2525_v10 = vld [vmem:[%s2490_s4 + $0xc] sm:$0xff]   ;;  %vm1032_vm5 = vcmask 1045504  }
  0x22   : > { %1906 = vmatpush3.bf16.msra.mxu1 %v321_v4  ;;  %1993 = vmatprep.subr.bf16.mxu0 %v2414_v3  ;;  %v712_v6 = vld [vmem:[%s2490_s4 + $0x4] sm:$0xe]  ;;  %v2514_v7 = vld [vmem:[%s2490_s4 + $0x8] sm:$0xf]  ;;  %v2517_v8 = vsel %vm319_vm1, %v1806_v5, 0  ;;  %v881_v13 = vshrl.u32 %v2525_v10, 16 }
  0x23   : > { %1995 = vmatprep.mubr.msk.bf16.mxu0 %vm2415_vm2, %v2414_v3  ;;  %v2522_v9 = vcombine.low %v712_v6, %v2514_v7  ;;  %1927 = vmatprep.subr.bf16.mxu1 %v2414_v3  ;;  %vm871_vm4 = vsmask.f32 6400  ;;  %v884_v14 = vshll.u32 %v2525_v10, 16  ;;  %v1813_v15 = vld [vmem:[%s2495_s7 + $0xa] sm:$0x3]  ;;  %v2541_v22 = vld [vmem:[%s2490_s4 + $0x14] sm:$0xff]  }
  0x24   : > { %1994 = vmatpush3.bf16.msra.mxu0 %v2517_v8  ;;  %v1775_v16 = vld [vmem:[%s2495_s7 + $0x2] sm:$0x3]  ;;  %v883_v19 = vrot.slane %v881_v13, 1  ;;  %v2332_v25 = vld [vmem:[%s2490_s4 + $0x8] sm:$0xff]   ;;  %v1060_v26 = vsel %vm319_vm1, %v1813_v15, 0  ;;  %v890_v27 = vshrl.u32 %v2541_v22, 16 }
  0x25   : > { %1908 = vmatmul.mubr.msk.bf16.vlgmr.msra.gmra.mrb[0].mxu1 %vm303_vm3, %v2329_v2  ;;  %2015 = vmatprep.subr.bf16.mxu0 %v2414_v3  ;;  %v873_v11 = vshrl.u32 %v2522_v9, 16  ;;  %v876_v12 = vshll.u32 %v2522_v9, 16  ;;  %v886_v20 = vrot.slane %v884_v14, 2  ;;  %v508_v21 = vsel %vm319_vm1, %v1775_v16, 0  ;;  %v2548_v29 = vld [vmem:[%s2490_s4 + $0x1c] sm:$0xff]   ;;  %v2334_v37 = vld [vmem:[%s2490_s4 + $0x10] sm:$0xff]  }
  0x26   : > { %1911 = vmatprep.mubr.msk.bf16.mxu1 %vm2415_vm2, %v2414_v3  ;;  %1928 = vmatpush3.bf16.msra.mxu1 %v508_v21  ;;  %v893_v28 = vshll.u32 %v2541_v22, 16  ;;  %v892_v31 = vrot.slane %v890_v27, 1  ;;  %v899_v33 = vshrl.u32 %v2548_v29, 16  ;;  %v902_v34 = vshll.u32 %v2548_v29, 16  ;;  %v1026_v41 = vld [vmem:[%s2490_s4 + $0x4] sm:$0xc] }
  0x27   : > { %v875_v17 = vrot.slane %v873_v11, 1  ;;  %v878_v18 = vrot.slane %v876_v12, 2  ;;  %v887_v24 = vor.u32 %v886_v20, %v883_v19  ;;  %1949 = vmatprep.subr.bf16.mxu1 %v2414_v3  ;;  %v406_v42 = vld [vmem:[%s2490_s4] sm:$0xf]  ;;  %v2574_v43 = vld [vmem:[%s2490_s4 + $0x4] sm:$0xf]  ;;  %v1814_v46 = vcombine.low %v1026_v41, %v2514_v7 }
  0x28   : > { %v895_v32 = vrot.slane %v893_v28, 2  ;;  %v901_v38 = vrot.slane %v899_v33, 1  ;;  %v904_v39 = vrot.slane %v902_v34, 2  ;;  %v2336_v45 = vld [vmem:[%s2490_s4 + $0x18] sm:$0xff]   ;;  %v1776_v47 = vcombine.low %v406_v42, %v2574_v43  ;;  %v2589_v50 = vld [vmem:[%s2490_s4 + $0x8] sm:$0xff]   ;;  %v2338_v54 = vld [vmem:[%s2490_s4 + $0x20] sm:$0xff]  }
  0x29   : > { %v879_v23 = vor.u32 %v878_v18, %v875_v17  ;;  %v1033_v48 = vrot.slane %v1814_v46, 2  ;;  %v1034_v49 = vrot.slane %v2525_v10, 2  ;;  %v1820_v52 = vld [vmem:[%s2495_s7 + $0xc] sm:$0x3]  ;;  %v456_v58 = vshll.u32 %v2589_v50, 16  ;;  %v2600_v60 = vld [vmem:[%s2490_s4 + $0x10] sm:$0xff]  }
  0x2a   : > { %v896_v35 = vor.u32 %v895_v32, %v892_v31  ;;  %v2567_v40 = vor.u32 %v904_v39, %v901_v38  ;;  %v451_v51 = vshll.u32 %v1776_v47, 16  ;;  %v1213_v55 = vsel %vm319_vm1, %v1820_v52, 0  ;;  %v1787_v1 = vld [vmem:[%s2495_s7 + $0x4] sm:$0x3]  ;;  %v1459_v13 = vld [vmem:[%s2490_s4 + $0x8] sm:$0x8] }
  0x2b   : > { %v888_v30 = vsel %vm871_vm4, %v879_v23, %v887_v24  ;;  %v1035_v53 = vsel %vm1032_vm5, %v1033_v48, %v1034_v49  ;;  %v449_v56 = vshrl.u32 %v1776_v47, 16  ;;  %v1036_v59 = vrot.slane %v2541_v22, 2  ;;  %v2629_v16 = vld [vmem:[%s2490_s4 + $0x18] sm:$0xff]   ;;  %v2356_v17 = vld [vmem:[%s2490_s4 + $0x2c] ss:$0 sps:$4 sm:$0x11]  }
  0x2c   : > { %1996 = vmatmul.mubr.msk.bf16.vlgmr.msra.gmra.mrb[0].mxu0 %vm303_vm3, %v888_v30  ;;  %v897_v36 = vsel %vm871_vm4, %v887_v24, %v896_v35  ;;  %v906_v44 = vsel %vm871_vm4, %v896_v35, %v2567_v40  ;;  %v453_v57 = vrot.slane %v451_v51, 1  ;;  %v458_v62 = vrot.slane %v456_v58, 1  ;;  %v2634_v18 = vld [vmem:[%s2490_s4 + $0xc] sm:$0xf]  ;;  %v2637_v19 = vld [vmem:[%s2490_s4 + $0x10] sm:$0xff]   ;;  %v2654_v27 = vld [vmem:[%s2490_s4 + $0x20] sm:$0xff]  }
  0x2d   : > { %2016 = vmatpush3.bf16.msra.mxu0 %v1060_v26  ;;  %1912 = vmatmul.mubr.msk.bf16.gmra.mrb[4].mxu1 %vm303_vm3, %v2332_v25  ;;  %v753_v63 = vrot.slane %v2522_v9, 1  ;;  %v754_v0 = vrot.slane %v2525_v10, 1  ;;  %vm447_vm6 = vsmask.f32 7424  ;;  %vm599_vm7 = vcmask 1046528   ;;  %v2619_v10 = vld [vmem:[%s2490_s4 + $0x24] sm:$0xff]  }
  0x2e   : > { %1999 = vmatprep.mubr.msk.bf16.mxu0 %vm2415_vm2, %v2414_v3  ;;  %1915 = vmatprep.mubr.msk.bf16.mxu1 %vm2415_vm2, %v2414_v3  ;;  %v454_v61 = vor.u32 %v453_v57, %v449_v56  ;;  %v756_v4 = vrot.slane %v2541_v22, 1  ;;  %v1037_v5 = vsel %vm1032_vm5, %v1034_v49, %v1036_v59  ;;  %v460_v6 = vshrl.u32 %v2589_v50, 16  ;;  %v2651_v26 = vld [vmem:[%s2490_s4 + $0x18] sm:$0xff]   ;;  %v2344_v32 = vld [vmem:[%s2490_s4 + $0x2c] ss:$0 sps:$4 sm:$0x33]  }
  0x2f   : > { %2037 = vmatprep.subr.bf16.mxu0 %v2414_v3  ;;  %v2611_v2 = vsel %vm599_vm7, %v753_v63, %v754_v0  ;;  %v464_v7 = vshll.u32 %v2600_v60, 16  ;;  %v758_v12 = vrot.slane %v2548_v29, 1  ;;  %v1038_v14 = vrot.slane %v2548_v29, 2  ;;  %v2670_v41 = vld [vmem:[%s2490_s4 + $0x28] sm:$0xff]   ;;  %p1846_p11 = scmp.ne.s32.totalorder %s2387_s12, 2 }
  0x30   : > { %v459_v9 = vsel %vm447_vm6, %v454_v61, %v458_v62  ;;  %v2622_v11 = vsel %vm599_vm7, %v754_v0, %v756_v4  ;;  %v627_v15 = vsel %vm319_vm1, %v1787_v1, 0  ;;  %v760_v21 = vrot.slane %v2619_v10, 1  ;;  %v2698_v61 = vld [vmem:[%s2490_s4 + $0x20] sm:$0xff]  }
  0x31   : > { %v2640_v20 = vsel %vm599_vm7, %v756_v4, %v758_v12  ;;  %v462_v22 = vor.u32 %v460_v6, %v458_v62  ;;  %v466_v23 = vrot.slane %v464_v7, 1  ;;  %v1840_v24 = vcombine.low %v1459_v13, %v2634_v18 }
  0x32   : > { %v468_v25 = vshrl.u32 %v2600_v60, 16  ;;  %v2657_v28 = vsel %vm599_vm7, %v758_v12, %v760_v21  ;;  %vm1465_vm8 = vcmask 1044480   ;;  %v1467_v29 = vrot.slane %v2637_v19, 3  ;;  %v2719_v12 = vld [vmem:[%s2490_s4 + $0x28] ss:$0 sps:$4 sm:$0x11]  }
  0x33   : > { %v1039_v30 = vsel %vm1032_vm5, %v1036_v59, %v1038_v14  ;;  %v472_v31 = vshll.u32 %v2629_v16, 16  ;;  %v1466_v33 = vrot.slane %v1840_v24, 3  ;;  %v762_v34 = vrot.slane %v2356_v17, 1 }
  0x34   : > { %2000 = vmatmul.mubr.msk.bf16.gmra.mrb[4].mxu0 %vm303_vm3, %v897_v36  ;;  %v1469_v35 = vrot.slane %v2651_v26, 3  ;;  %v908_v36 = vshrl.u32 %v2619_v10, 16  ;;  %v1471_v38 = vrot.slane %v2654_v27, 3  ;;  %v467_v39 = vsel %vm447_vm6, %v462_v22, %v466_v23 }
  0x35   : > { %1916 = vmatmul.mubr.msk.bf16.gmra.mrb[8].mxu1 %vm303_vm3, %v2334_v37  ;;  %2003 = vmatprep.mubr.msk.bf16.mxu0 %vm2415_vm2, %v2414_v3  ;;  %v911_v37 = vshll.u32 %v2619_v10, 16  ;;  %v2673_v42 = vsel %vm1465_vm8, %v1466_v33, %v1467_v29  ;;  %v920_v52 = vshll.u32 %v2344_v32, 16  ;;  %v470_v58 = vor.u32 %v468_v25, %v466_v23  ;;  %v1832_v25 = vld [vmem:[%s2495_s7 + $0xe] sm:$0x3] }
  0x36   : > { %1919 = vmatprep.mubr.msk.bf16.mxu1 %vm2415_vm2, %v2414_v3  ;;  %v2679_v46 = vsel %vm1465_vm8, %v1467_v29, %v1469_v35  ;;  %v910_v47 = vrot.slane %v908_v36, 1  ;;  %v2682_v49 = vsel %vm1465_vm8, %v1469_v35, %v1471_v38  ;;  %v474_v59 = vrot.slane %v472_v31, 1  ;;  %v593_v29 = vld [vmem:[%s2490_s4] sm:$0xe] }
  0x37   : > { %v913_v48 = vrot.slane %v911_v37, 2  ;;  %v922_v56 = vrot.slane %v920_v52, 2  ;;  %v480_v6 = vshll.u32 %v2698_v61, 16  ;;  %v484_v17 = vshrl.u32 %v2698_v61, 16  ;;  %v1794_v37 = vld [vmem:[%s2495_s7 + $0x6] sm:$0x3] }
  0x38   : > { %v475_v4 = vsel %vm447_vm6, %v470_v58, %v474_v59  ;;  %v1187_v23 = vrot.slane %v2637_v19, 2  ;;  %v1374_v31 = vsel %vm319_vm1, %v1832_v25, 0  ;;  %v1788_v33 = vcombine.low %v593_v29, %v2574_v43  ;;  %v2353_v52 = vld [vmem:[%s2490_s4 + $0x30] ss:$0 sps:$4 sm:$0x33]  }
  0x39   : > { %v601_v36 = vrot.slane %v2589_v50, 1  ;;  %v603_v50 = vrot.slane %v2600_v60, 1  ;;  %v605_v60 = vrot.slane %v2629_v16, 1  ;;  %vm1304_vm9 = vsmask.f32 5376 }
  0x3a   : > { %v600_v35 = vrot.slane %v1788_v33, 1  ;;  %v1335_v25 = vshll.u32 %v2654_v27, 16  ;;  %vm1578_vm10 = vcmask 64512  }
  0x3c   : > { %2004 = vmatmul.mubr.msk.bf16.gmra.mrb[8].mxu0 %vm303_vm3, %v906_v44  ;;  %v2676_v44 = vsel %vm599_vm7, %v760_v21, %v762_v34  ;;  %v488_v21 = vshll.u32 %v2719_v12, 16  ;;  %v1189_v34 = vrot.slane %v2651_v26, 2 }
  0x3d   : > { %1920 = vmatmul.mubr.msk.bf16.gmra.mrb[12].mxu1 %vm303_vm3, %v2336_v45  ;;  %2017 = vmatprep.mubr.msk.bf16.mxu0 %vm2415_vm2, %v2414_v3  ;;  %v917_v45 = vshrl.u32 %v2344_v32, 16 }
  0x3e   : > { %1923 = vmatprep.mubr.msk.bf16.mxu1 %vm2415_vm2, %v2414_v3  ;;  %v490_v24 = vrot.slane %v488_v21, 1  ;;  %v1190_v43 = vsel %vm1032_vm5, %v1187_v23, %v1189_v34 }
  0x3f   : > { %v919_v51 = vrot.slane %v917_v45, 1  ;;  %v1191_v45 = vrot.slane %v2654_v27, 2 }
  0x41   : > { %v923_v63 = vor.u32 %v922_v56, %v919_v51  ;;  %v1193_v51 = vrot.slane %v2670_v41, 2  ;;  %v1195_v56 = vrot.slane %v2353_v52, 2  ;;  %v258_v52 = vld [vmem:[#allocation2 + $0x8] sm:$0xff] }
  0x44   : > { %2018 = vmatmul.mubr.msk.bf16.vlgmr.msra.gmra.mrb[0].mxu0 %vm303_vm3, %v1035_v53  ;;  %v1473_v53 = vrot.slane %v2670_v41, 3 }
  0x45   : > { %2038 = vmatpush3.bf16.msra.mxu0 %v1213_v55  ;;  %1924 = vmatmul.mubr.msk.bf16.gmra.mrb[16].mxu1 %vm303_vm3, %v2338_v54  ;;  %v914_v54 = vor.u32 %v913_v48, %v910_v47  ;;  %v1040_v55 = vrot.slane %v2619_v10, 2  ;;  %v1145_v10 = vld [vmem:[%s2490_s4 + $0x8] sm:$0xc]  ;;  %v1192_v47 = vsel %vm1032_vm5, %v1189_v34, %v1191_v45  ;;  %v604_v48 = vsel %vm599_vm7, %v601_v36, %v603_v50 }
  0x46   : > { %2021 = vmatprep.mubr.msk.bf16.mxu0 %vm2415_vm2, %v2414_v3  ;;  %1929 = vmatprep.mubr.msk.bf16.mxu1 %vm2415_vm2, %v2414_v3  ;;  %v2693_v57 = vsel %vm1465_vm8, %v1471_v38, %v1473_v53  ;;  %v602_v38 = vsel %vm599_vm7, %v600_v35, %v601_v36  ;;  %v2354_v36 = vld [vmem:[%s2490_s4 + $0x30] ss:$0 sps:$4 sm:$0x77]  }
  0x47   : > { %2059 = vmatprep.subr.bf16.mxu0 %v2414_v3  ;;  %v2702_v62 = vsel %vm871_vm4, %v2567_v40, %v914_v54  ;;  %v1041_v0 = vsel %vm1032_vm5, %v1038_v14, %v1040_v55  ;;  %v2706_v1 = vsel %vm871_vm4, %v914_v54, %v923_v63  ;;  %v1042_v40 = vrot.slane %v2344_v32, 2 }
  0x48   : > { %v1821_v14 = vcombine.low %v1145_v10, %v2634_v18  ;;  %v1194_v54 = vsel %vm1032_vm5, %v1191_v45, %v1193_v51  ;;  %v1314_v63 = vshrl.u32 %v2637_v19, 16 }
  0x49   : > { %v1043_v13 = vsel %vm1032_vm5, %v1040_v55, %v1042_v40  ;;  %v606_v55 = vsel %vm599_vm7, %v603_v50, %v605_v60 }
  0x4a   : > { %v1186_v22 = vrot.slane %v1821_v14, 2  ;;  %v1306_v58 = vshrl.u32 %v1821_v14, 16  ;;  %v1316_v40 = vrot.slane %v1314_v63, 2 }
  0x4c   : > { %2022 = vmatmul.mubr.msk.bf16.gmra.mrb[4].mxu0 %vm303_vm3, %v1037_v5  ;;  %v476_v5 = vshrl.u32 %v2629_v16, 16  ;;  %v607_v16 = vrot.slane %v2698_v61, 1  ;;  %v1323_v61 = vshrl.u32 %v2651_v26, 16 }
  0x4d   : > { %1930 = vmatmul.mubr.msk.bf16.vlgmr.msra.gmra.mrb[0].mxu1 %vm303_vm3, %v459_v9  ;;  %2025 = vmatprep.mubr.msk.bf16.mxu0 %vm2415_vm2, %v2414_v3  ;;  %v482_v9 = vrot.slane %v480_v6, 1 }
  0x4e   : > { %1933 = vmatprep.mubr.msk.bf16.mxu1 %vm2415_vm2, %v2414_v3  ;;  %1950 = vmatpush3.bf16.msra.mxu1 %v627_v15  ;;  %v478_v7 = vor.u32 %v476_v5, %v474_v59  ;;  %v1309_v59 = vshll.u32 %v1821_v14, 16  ;;  %v1308_v5 = vrot.slane %v1306_v58, 2  ;;  %v609_v14 = vrot.slane %v2719_v12, 1 }
  0x4f   : > { %1971 = vmatprep.subr.bf16.mxu1 %v2414_v3  ;;  %v486_v18 = vor.u32 %v484_v17, %v482_v9  ;;  %v1325_v21 = vrot.slane %v1323_v61, 2 }
  0x50   : > { %v483_v15 = vsel %vm447_vm6, %v478_v7, %v482_v9  ;;  %v1311_v6 = vrot.slane %v1309_v59, 3  ;;  %v608_v9 = vsel %vm599_vm7, %v605_v60, %v607_v16 }
  0x51   : > { %v491_v32 = vsel %vm447_vm6, %v486_v18, %v490_v24  ;;  %v610_v18 = vsel %vm599_vm7, %v607_v16, %v609_v14  ;;  %v1332_v24 = vshrl.u32 %v2654_v27, 16  ;;  %v260_v16 = vld [vmem:[#allocation2 + $0x18] sm:$0xff] }
  0x53   : > { %v1334_v29 = vrot.slane %v1332_v24, 2 }
  0x54   : > { %2026 = vmatmul.mubr.msk.bf16.gmra.mrb[8].mxu0 %vm303_vm3, %v1039_v30  ;;  %v1188_v30 = vsel %vm1032_vm5, %v1186_v22, %v1187_v23 }
  0x55   : > { %1934 = vmatmul.mubr.msk.bf16.gmra.mrb[4].mxu1 %vm303_vm3, %v467_v39  ;;  %2029 = vmatprep.mubr.msk.bf16.mxu0 %vm2415_vm2, %v2414_v3  ;;  %v780_v39 = vsel %vm319_vm1, %v1794_v37, 0  ;;  %v1350_v37 = vshrl.u32 %v2354_v36, 16 }
  0x56   : > { %1937 = vmatprep.mubr.msk.bf16.mxu1 %vm2415_vm2, %v2414_v3 }
  0x5c   : > { %2030 = vmatmul.mubr.msk.bf16.gmra.mrb[12].mxu0 %vm303_vm3, %v1041_v0  ;;  %v1317_v0 = vshll.u32 %v2637_v19, 16  ;;  %v1312_v19 = vor.u32 %v1311_v6, %v1308_v5 }
  0x5d   : > { %1938 = vmatmul.mubr.msk.bf16.gmra.mrb[8].mxu1 %vm303_vm3, %v475_v4  ;;  %2033 = vmatprep.mubr.msk.bf16.mxu0 %vm2415_vm2, %v2414_v3  ;;  %v1196_v4 = vsel %vm1032_vm5, %v1193_v51, %v1195_v56 }
  0x5e   : > { %1941 = vmatprep.mubr.msk.bf16.mxu1 %vm2415_vm2, %v2414_v3  ;;  %v1319_v7 = vrot.slane %v1317_v0, 3  ;;  %v259_v0 = vld [vmem:[#allocation2 + $0x10] sm:$0xff] }
  0x60   : > { %v1320_v10 = vor.u32 %v1319_v7, %v1316_v40 }
  0x62   : > { %v1321_v17 = vsel %vm1304_vm9, %v1312_v19, %v1320_v10 }
  0x64   : > { %2034 = vmatmul.mubr.msk.bf16.gmra.mrb[16].mxu0 %vm303_vm3, %v1043_v13  ;;  %v1326_v13 = vshll.u32 %v2651_v26, 16 }
  0x65   : > { %1942 = vmatmul.mubr.msk.bf16.gmra.mrb[12].mxu1 %vm303_vm3, %v483_v15  ;;  %2039 = vmatprep.mubr.msk.bf16.mxu0 %vm2415_vm2, %v2414_v3  ;;  %v1839_v15 = vld [vmem:[%s2495_s7 + $0x10] sm:$0x3] }
  0x66   : > { %1945 = vmatprep.mubr.msk.bf16.mxu1 %vm2415_vm2, %v2414_v3  ;;  %v1328_v22 = vrot.slane %v1326_v13, 3  ;;  %v1493_v23 = vsel %vm319_vm1, %v1839_v15, 0  ;;  %v261_v15 = vld [vmem:[#allocation2 + $0x20] sm:$0xff] }
  0x68   : > { %v1329_v26 = vor.u32 %v1328_v22, %v1325_v21  ;;  %v262_v21 = vld [vmem:[#allocation2 + $0x28] sm:$0xff] }
  0x6a   : > { %v1330_v12 = vsel %vm1304_vm9, %v1320_v10, %v1329_v26 }
  0x6c   : > { %2040 = vmatmul.mubr.msk.bf16.vlgmr.msra.gmra.mrb[0].mxu0 %vm303_vm3, %v1188_v30  ;;  %v1337_v30 = vrot.slane %v1335_v25, 3 }
  0x6d   : > { %2060 = vmatpush3.bf16.msra.mxu0 %v1374_v31  ;;  %1946 = vmatmul.mubr.msk.bf16.gmra.mrb[16].mxu1 %vm303_vm3, %v491_v32  ;;  %v1341_v31 = vshrl.u32 %v2670_v41, 16  ;;  %v1344_v32 = vshll.u32 %v2670_v41, 16 }
  0x6e   : > { %2043 = vmatprep.mubr.msk.bf16.mxu0 %vm2415_vm2, %v2414_v3  ;;  %1951 = vmatprep.mubr.msk.bf16.mxu1 %vm2415_vm2, %v2414_v3  ;;  %v1338_v27 = vor.u32 %v1337_v30, %v1334_v29 }
  0x6f   : > { %2081 = vmatprep.subr.bf16.mxu0 %v2414_v3  ;;  %v1343_v34 = vrot.slane %v1341_v31, 2  ;;  %v1346_v35 = vrot.slane %v1344_v32, 3  ;;  %v263_v32 = vld [vmem:[#allocation2 + $0x30] sm:$0xff] }
  0x70   : > { %v1339_v33 = vsel %vm1304_vm9, %v1329_v26, %v1338_v27 }
  0x74   : > { %2044 = vmatmul.mubr.msk.bf16.gmra.mrb[4].mxu0 %vm303_vm3, %v1190_v43  ;;  %v1353_v43 = vshll.u32 %v2354_v36, 16 }
  0x75   : > { %1952 = vmatmul.mubr.msk.bf16.vlgmr.msra.gmra.mrb[0].mxu1 %vm303_vm3, %v602_v38  ;;  %2047 = vmatprep.mubr.msk.bf16.mxu0 %vm2415_vm2, %v2414_v3  ;;  %v1352_v38 = vrot.slane %v1350_v37, 2 }
  0x76   : > { %1955 = vmatprep.mubr.msk.bf16.mxu1 %vm2415_vm2, %v2414_v3  ;;  %1972 = vmatpush3.bf16.msra.mxu1 %v780_v39  ;;  %v1355_v39 = vrot.slane %v1353_v43, 3 }
  0x77   : > { %2103 = vmatprep.subr.bf16.mxu1 %v2414_v3 }
  0x7c   : > { %2048 = vmatmul.mubr.msk.bf16.gmra.mrb[8].mxu0 %vm303_vm3, %v1192_v47 }
  0x7d   : > { %1956 = vmatmul.mubr.msk.bf16.gmra.mrb[4].mxu1 %vm303_vm3, %v604_v48  ;;  %2051 = vmatprep.mubr.msk.bf16.mxu0 %vm2415_vm2, %v2414_v3 }
  0x7e   : > { %1959 = vmatprep.mubr.msk.bf16.mxu1 %vm2415_vm2, %v2414_v3 }
  0x84   : > { %2052 = vmatmul.mubr.msk.bf16.gmra.mrb[12].mxu0 %vm303_vm3, %v1194_v54 }
  0x85   : > { %1960 = vmatmul.mubr.msk.bf16.gmra.mrb[8].mxu1 %vm303_vm3, %v606_v55  ;;  %2055 = vmatprep.mubr.msk.bf16.mxu0 %vm2415_vm2, %v2414_v3 }
  0x86   : > { %1963 = vmatprep.mubr.msk.bf16.mxu1 %vm2415_vm2, %v2414_v3 }
  0x8c   : > { %2056 = vmatmul.mubr.msk.bf16.gmra.mrb[16].mxu0 %vm303_vm3, %v1196_v4 }
  0x8d   : > { %1964 = vmatmul.mubr.msk.bf16.gmra.mrb[12].mxu1 %vm303_vm3, %v608_v9  ;;  %2061 = vmatprep.mubr.msk.bf16.mxu0 %vm2415_vm2, %v2414_v3 }
  0x8e   : > { %1967 = vmatprep.mubr.msk.bf16.mxu1 %vm2415_vm2, %v2414_v3 }
  0x94   : > { %2062 = vmatmul.mubr.msk.bf16.vlgmr.msra.gmra.mrb[0].mxu0 %vm303_vm3, %v1321_v17 }
  0x95   : > { %2082 = vmatpush3.bf16.msra.mxu0 %v1493_v23  ;;  %1968 = vmatmul.mubr.msk.bf16.gmra.mrb[16].mxu1 %vm303_vm3, %v610_v18 }
  0x96   : > { %2065 = vmatprep.mubr.msk.bf16.mxu0 %vm2415_vm2, %v2414_v3  ;;  %1973 = vmatprep.mubr.msk.bf16.mxu1 %vm2415_vm2, %v2414_v3 }
  0x9c   : > { %2066 = vmatmul.mubr.msk.bf16.gmra.mrb[4].mxu0 %vm303_vm3, %v1330_v12 }
  0x9d   : > { %1974 = vmatmul.mubr.msk.bf16.vlgmr.msra.gmra.mrb[0].mxu1 %vm303_vm3, %v2611_v2  ;;  %2069 = vmatprep.mubr.msk.bf16.mxu0 %vm2415_vm2, %v2414_v3  ;;  %v1347_v2 = vor.u32 %v1346_v35, %v1343_v34  ;;  %v264_v34 = vld [vmem:[#allocation2 + $0x38] sm:$0xff] }
  0x9e   : > { %1977 = vmatprep.mubr.msk.bf16.mxu1 %vm2415_vm2, %v2414_v3  ;;  %2104 = vmatpush3.bf16.msra.mxu1 %v2517_v8 }
  0x9f   : > { %v1348_v8 = vsel %vm1304_vm9, %v1338_v27, %v1347_v2 }
  0xa4   : > { %2070 = vmatmul.mubr.msk.bf16.gmra.mrb[8].mxu0 %vm303_vm3, %v1339_v33 }
  0xa5   : > { %1978 = vmatmul.mubr.msk.bf16.gmra.mrb[4].mxu1 %vm303_vm3, %v2622_v11  ;;  %2073 = vmatprep.mubr.msk.bf16.mxu0 %vm2415_vm2, %v2414_v3  ;;  %v1356_v11 = vor.u32 %v1355_v39, %v1352_v38 }
  0xa6   : > { %1981 = vmatprep.mubr.msk.bf16.mxu1 %vm2415_vm2, %v2414_v3 }
  0xa7   : > { %v1357_v45 = vsel %vm1304_vm9, %v1347_v2, %v1356_v11  ;;  %v265_v11 = vld [vmem:[#allocation2 + $0x40] sm:$0xff] }
  0xac   : > { %2074 = vmatmul.mubr.msk.bf16.gmra.mrb[12].mxu0 %vm303_vm3, %v1348_v8 }
  0xad   : > { %1982 = vmatmul.mubr.msk.bf16.gmra.mrb[8].mxu1 %vm303_vm3, %v2640_v20  ;;  %2077 = vmatprep.mubr.msk.bf16.mxu0 %vm2415_vm2, %v2414_v3  ;;  %v1475_v20 = vrot.slane %v2354_v36, 3 }
  0xae   : > { %1985 = vmatprep.mubr.msk.bf16.mxu1 %vm2415_vm2, %v2414_v3 }
  0xb4   : > { %2078 = vmatmul.mubr.msk.bf16.gmra.mrb[16].mxu0 %vm303_vm3, %v1357_v45  ;;  %v266_v45 = vld [vmem:[#allocation2 + $0x48] sm:$0xff] }
  0xb5   : > { %1986 = vmatmul.mubr.msk.bf16.gmra.mrb[12].mxu1 %vm303_vm3, %v2657_v28  ;;  %2083 = vmatprep.mubr.msk.bf16.mxu0 %vm2415_vm2, %v2414_v3  ;;  %v1476_v28 = vsel %vm1465_vm8, %v1473_v53, %v1475_v20 }
  0xb6   : > { %1989 = vmatprep.mubr.msk.bf16.mxu1 %vm2415_vm2, %v2414_v3 }
  0xbc   : > { %2084 = vmatmul.mubr.msk.bf16.vlgmr.msra.gmra.mrb[0].mxu0 %vm303_vm3, %v2673_v42 }
  0xbd   : > { %1990 = vmatmul.mubr.msk.bf16.gmra.mrb[16].mxu1 %vm303_vm3, %v2676_v44  ;;  %2087 = vmatprep.mubr.msk.bf16.mxu0 %vm2415_vm2, %v2414_v3 }
  0xbe   : > { %2007 = vmatprep.mubr.msk.bf16.mxu1 %vm2415_vm2, %v2414_v3 }
  0xc4   : > { %2088 = vmatmul.mubr.msk.bf16.gmra.mrb[4].mxu0 %vm303_vm3, %v2679_v46 }
  0xc5   : > { %2008 = vmatmul.mubr.msk.bf16.vlgmr.msra.gmra.mrb[12].mxu1 %vm303_vm3, %v2702_v62  ;;  %2091 = vmatprep.mubr.msk.bf16.mxu0 %vm2415_vm2, %v2414_v3 }
  0xc6   : > { %2011 = vmatprep.mubr.msk.bf16.mxu1 %vm2415_vm2, %v2414_v3 }
  0xcc   : > { %2092 = vmatmul.mubr.msk.bf16.gmra.mrb[8].mxu0 %vm303_vm3, %v2682_v49 }
  0xcd   : > { %2012 = vmatmul.mubr.msk.bf16.gmra.mrb[16].mxu1 %vm303_vm3, %v2706_v1  ;;  %2095 = vmatprep.mubr.msk.bf16.mxu0 %vm2415_vm2, %v2414_v3 }
  0xd4   : > { %2096 = vmatmul.mubr.msk.bf16.gmra.mrb[12].mxu0 %vm303_vm3, %v2693_v57 }
  0xd5   : > { %2099 = vmatprep.mubr.msk.bf16.mxu0 %vm2415_vm2, %v2414_v3  ;;  %v257_v3 = vld [vmem:[#allocation2] sm:$0xff] }
  0xdc   : > { %2100 = vmatmul.mubr.msk.bf16.gmra.mrb[16].mxu0 %vm303_vm3, %v1476_v28 }
 0x170   : > { %v816_v42 = vpop.f32.mrb[0].mxu1 }
 0x171   : > { %v1975_v44 = vpop.f32.mrb[1].mxu1  ;;  %v2105_v54 = vadd.f32 %v816_v42, %v257_v3 }
 0x172   : > { %v819_v46 = vpop.f32.mrb[2].mxu1 }
 0x173   : > { %v1976_v49 = vpop.f32.mrb[3].mxu1  ;;  %v2107_v53 = vadd.f32 %v819_v46, %v258_v52 }
 0x178   : > { %v824_v62 = vpop.f32.mrb[4].mxu1 }
 0x179   : > { %v1979_v1 = vpop.f32.mrb[5].mxu1  ;;  %v2109_v4 = vadd.f32 %v824_v62, %v259_v0 }
 0x17a   : > { %v827_v50 = vpop.f32.mrb[6].mxu1 }
 0x17b   : > { %v1980_v47 = vpop.f32.mrb[7].mxu1  ;;  %v2111_v6 = vadd.f32 %v827_v50, %v260_v16  ;;  %v1847_v50 = vld [vmem:[%s2940_s2] ss:$0 sm:$0xff] (!%p1846_p11) }
 0x17c   : > { %v1848_v47 = vld [vmem:[%s2940_s2 + $0x1] ss:$0 sm:$0xff] (!%p1846_p11) }
 0x180   : > { %v832_v48 = vpop.f32.mrb[8].mxu1 }
 0x181   : > { %v1983_v57 = vpop.f32.mrb[9].mxu1  ;;  %v2113_v22 = vadd.f32 %v832_v48, %v261_v15 }
 0x182   : > { %v835_v51 = vpop.f32.mrb[10].mxu1 }
 0x183   : > { %v1984_v60 = vpop.f32.mrb[11].mxu1  ;;  %v2115_v18 = vadd.f32 %v835_v51, %v262_v21 }
 0x18f   : > { %v1529_v41 = vpop.f32.mrb[0].mxu0 }
 0x190   : > { %v2872_v55 = vadd.f32 %v2105_v54, %v1529_v41  ;;  %v2085_v56 = vpop.f32.mrb[1].mxu0 }
 0x191   : > { %v1532_v58 = vpop.f32.mrb[2].mxu0 }
 0x192   : > { %1579 = vst.msk [vmem:[#allocation2] sm:$0xff] %vm1578_vm10, %v2872_v55  ;;  %v2876_v59 = vadd.f32 %v2107_v53, %v1532_v58  ;;  %v2086_v63 = vpop.f32.mrb[3].mxu0  ;;  %v1598_v48 = vmul.f32 (!%p1846_p11), %v2872_v55, %v1847_v50 }
 0x194   : > { %1580 = vst.msk [vmem:[#allocation2 + $0x8] sm:$0xff] %vm1578_vm10, %v2876_v59  ;;  %v1599_v57 = vmul.f32 (!%p1846_p11), %v2876_v59, %v1847_v50  ;;  %v1613_v53 = vadd.f32 (!%p1846_p11), %v1848_v47, %v1598_v48 }
 0x196   : > { %v1614_v56 = vadd.f32 (!%p1846_p11), %v1848_v47, %v1599_v57  ;;  %v1623_v59 = vmax.f32 (!%p1846_p11), %v1613_v53, 0.0 }
 0x197   : > { %v1537_v5 = vpop.f32.mrb[4].mxu0 }
 0x198   : > { %v2110_v40 = vadd.f32 %v2109_v4, %v1537_v5  ;;  %v2089_v7 = vpop.f32.mrb[5].mxu0  ;;  %v1001_v9 = vpop.f32.mrb[12].mxu1  ;;  %v1624_v5 = vmax.f32 (!%p1846_p11), %v1614_v56, 0.0  ;;  %1633 = vst.msk [vmem:[%s2501_s24] sm:$0xff] (!%p1846_p11), %vm1578_vm10, %v1623_v59 }
 0x199   : > { %v1540_v19 = vpop.f32.mrb[6].mxu0  ;;  %v2009_v10 = vpop.f32.mrb[13].mxu1  ;;  %v2117_v35 = vadd.f32 %v1001_v9, %v263_v32 }
 0x19a   : > { %1581 = vst.msk [vmem:[#allocation2 + $0x10] sm:$0xff] %vm1578_vm10, %v2110_v40  ;;  %v2112_v61 = vadd.f32 %v2111_v6, %v1540_v19  ;;  %v2090_v13 = vpop.f32.mrb[7].mxu0  ;;  %v1004_v14 = vpop.f32.mrb[14].mxu1  ;;  %v1600_v51 = vmul.f32 (!%p1846_p11), %v2110_v40, %v1847_v50  ;;  %1634 = vst.msk [vmem:[%s2501_s24 + $0x8] sm:$0xff] (!%p1846_p11), %vm1578_vm10, %v1624_v5 }
 0x19b   : > { %v2010_v17 = vpop.f32.mrb[15].mxu1  ;;  %v2119_v2 = vadd.f32 %v1004_v14, %v264_v34 }
 0x19c   : > { %1582 = vst.msk [vmem:[#allocation2 + $0x18] sm:$0xff] %vm1578_vm10, %v2112_v61  ;;  %v1601_v60 = vmul.f32 (!%p1846_p11), %v2112_v61, %v1847_v50  ;;  %v1615_v58 = vadd.f32 (!%p1846_p11), %v1848_v47, %v1600_v51 }
 0x19e   : > { %v1616_v63 = vadd.f32 (!%p1846_p11), %v1848_v47, %v1601_v60  ;;  %v1625_v6 = vmax.f32 (!%p1846_p11), %v1615_v58, 0.0 }
 0x19f   : > { %v1545_v23 = vpop.f32.mrb[8].mxu0 }
 0x1a0   : > { %v2114_v26 = vadd.f32 %v2113_v22, %v1545_v23  ;;  %v2093_v24 = vpop.f32.mrb[9].mxu0  ;;  %v1009_v25 = vpop.f32.mrb[16].mxu1  ;;  %v1626_v40 = vmax.f32 (!%p1846_p11), %v1616_v63, 0.0  ;;  %1635 = vst.msk [vmem:[%s2501_s24 + $0x10] sm:$0xff] (!%p1846_p11), %vm1578_vm10, %v1625_v6 }
 0x1a1   : > { %v1548_v12 = vpop.f32.mrb[10].mxu0  ;;  %v2013_v29 = vpop.f32.mrb[17].mxu1  ;;  %v2121_v20 = vadd.f32 %v1009_v25, %v265_v11 }
 0x1a2   : > { %1583 = vst.msk [vmem:[#allocation2 + $0x20] sm:$0xff] %vm1578_vm10, %v2114_v26  ;;  %v2116_v30 = vadd.f32 %v2115_v18, %v1548_v12  ;;  %v2094_v27 = vpop.f32.mrb[11].mxu0  ;;  %v1012_v31 = vpop.f32.mrb[18].mxu1  ;;  %v1602_v3 = vmul.f32 (!%p1846_p11), %v2114_v26, %v1847_v50  ;;  %1636 = vst.msk [vmem:[%s2501_s24 + $0x18] sm:$0xff] (!%p1846_p11), %vm1578_vm10, %v1626_v40 }
 0x1a3   : > { %v2014_v33 = vpop.f32.mrb[19].mxu1  ;;  %v2123_v42 = vadd.f32 %v1012_v31, %v266_v45 }
 0x1a4   : > { %1584 = vst.msk [vmem:[#allocation2 + $0x28] sm:$0xff] %vm1578_vm10, %v2116_v30  ;;  %v1603_v52 = vmul.f32 (!%p1846_p11), %v2116_v30, %v1847_v50  ;;  %v1617_v0 = vadd.f32 (!%p1846_p11), %v1848_v47, %v1602_v3 }
 0x1a6   : > { %v1618_v16 = vadd.f32 (!%p1846_p11), %v1848_v47, %v1603_v52  ;;  %v1627_v7 = vmax.f32 (!%p1846_p11), %v1617_v0, 0.0 }
 0x1a7   : > { %v1553_v36 = vpop.f32.mrb[12].mxu0 }
 0x1a8   : > { %v2118_v37 = vadd.f32 %v2117_v35, %v1553_v36  ;;  %v2097_v43 = vpop.f32.mrb[13].mxu0  ;;  %v1628_v9 = vmax.f32 (!%p1846_p11), %v1618_v16, 0.0  ;;  %1637 = vst.msk [vmem:[%s2501_s24 + $0x20] sm:$0xff] (!%p1846_p11), %vm1578_vm10, %v1627_v7 }
 0x1a9   : > { %v1556_v8 = vpop.f32.mrb[14].mxu0 }
 0x1aa   : > { %1585 = vst.msk [vmem:[#allocation2 + $0x30] sm:$0xff] %vm1578_vm10, %v2118_v37  ;;  %v2120_v38 = vadd.f32 %v2119_v2, %v1556_v8  ;;  %v2098_v39 = vpop.f32.mrb[15].mxu0  ;;  %v1604_v54 = vmul.f32 (!%p1846_p11), %v2118_v37, %v1847_v50  ;;  %1638 = vst.msk [vmem:[%s2501_s24 + $0x28] sm:$0xff] (!%p1846_p11), %vm1578_vm10, %v1628_v9 }
 0x1ac   : > { %1586 = vst.msk [vmem:[#allocation2 + $0x38] sm:$0xff] %vm1578_vm10, %v2120_v38  ;;  %v1605_v41 = vmul.f32 (!%p1846_p11), %v2120_v38, %v1847_v50  ;;  %v1619_v4 = vadd.f32 (!%p1846_p11), %v1848_v47, %v1604_v54 }
 0x1ae   : > { %1592 = sbr.rel (%p1846_p11) target bundleno = 443 (0x1bb), region = 40  ;;  %v1620_v55 = vadd.f32 (!%p1846_p11), %v1848_v47, %v1605_v41  ;;  %v1629_v19 = vmax.f32 (!%p1846_p11), %v1619_v4, 0.0 }
 0x1af   : > { %v1561_v28 = vpop.f32.mrb[16].mxu0 }
 0x1b0   : > { %v2122_v44 = vadd.f32 %v2121_v20, %v1561_v28  ;;  %v2101_v46 = vpop.f32.mrb[17].mxu0  ;;  %v1630_v10 = vmax.f32 (!%p1846_p11), %v1620_v55, 0.0  ;;  %1639 = vst.msk [vmem:[%s2501_s24 + $0x30] sm:$0xff] (!%p1846_p11), %vm1578_vm10, %v1629_v19 }
 0x1b1   : > { %v1564_v49 = vpop.f32.mrb[18].mxu0 }
 0x1b2   : > { %1587 = vst.msk [vmem:[#allocation2 + $0x40] sm:$0xff] %vm1578_vm10, %v2122_v44  ;;  %v2124_v62 = vadd.f32 %v2123_v42, %v1564_v49  ;;  %v2102_v1 = vpop.f32.mrb[19].mxu0  ;;  %v1606_v61 = vmul.f32 (!%p1846_p11), %v2122_v44, %v1847_v50  ;;  %1640 = vst.msk [vmem:[%s2501_s24 + $0x38] sm:$0xff] (!%p1846_p11), %vm1578_vm10, %v1630_v10 }
 0x1b4   : > { %1588 = vst.msk [vmem:[#allocation2 + $0x48] sm:$0xff] %vm1578_vm10, %v2124_v62  ;;  %v1607_v13 = vmul.f32 (!%p1846_p11), %v2124_v62, %v1847_v50  ;;  %v1621_v14 = vadd.f32 (!%p1846_p11), %v1848_v47, %v1606_v61 }
 0x1b6   : > { %v1622_v15 = vadd.f32 %v1848_v47, %v1607_v13  ;;  %v1631_v17 = vmax.f32 %v1621_v14, 0.0 }
 0x1b8   : > { %v1632_v21 = vmax.f32 %v1622_v15, 0.0  ;;  %1641 = vst.msk [vmem:[%s2501_s24 + $0x40] sm:$0xff] %vm1578_vm10, %v1631_v17 }
 0x1ba   : > { %1642 = vst.msk [vmem:[%s2501_s24 + $0x48] sm:$0xff] %vm1578_vm10, %v1632_v21 }
 0x1bb PF: > { %s13_s18 = sadd.s32 1, %s2411_s18   ;;  %s2942_s12 = smov %s2399_s15 }
 0x1bc   : > { %p10_p12 = scmp.ge.s32.totalorder %s13_s18, 50   ;;  %s2943_s13 = smov %s2403_s16 }
 0x1bd   : > { %s2944_s14 = smov %s2407_s17  ;;  %s2945_s15 = smov %s2949_s19 }
 0x1be   : > { %s2946_s16 = smov %s2953_s20  ;;  %s2947_s17 = smov %s2957_s21 }
 0x1bf   :  { %12 = sbr.rel (!%p10_p12) target bundleno = 4 (0x4), region = 81 }

</bundles_post_ra>
